<compile_context>
chip_gen: v5e
topology: v5e:2x2
jax: 0.10.0
libtpu: 0.0.40
codegen_flags: <defaults>
</compile_context>

<pallas_src>
import functools
import math

import jax
import jax.numpy as jnp
from jax.experimental import pallas as pl
from jax.experimental.pallas import tpu as pltpu

VMEM_SPEC = pl.BlockSpec(memory_space=pltpu.MemorySpace.VMEM)


def _bwd_out_col(H, F):
    """Lane offset of the backward-direction output block inside the 6H-wide
    output-weight rows (lane-tile aligned when it fits)."""
    col = ((F + 127) // 128) * 128
    if col + F > 6 * H:
        col = F
    return col


# ----------------------------------------------------------------------------
# Fused kernel: preprocessing + bidirectional GRU (lane-packed) + linear
# ----------------------------------------------------------------------------
def _decoder_future_kernel(Tf, B, Z, H, F, bwd_col,
                           x_ref, w_ref, b_ref, o_ref):
    # x_ref: [B, T, Z] raw inputs (only the first Tf timesteps are read)
    # w_ref: [2Z + 4H, 6H] packed weight slab
    #          rows 0:2Z        -> W_i_all  (per-gate block-diag fwd|bwd)
    #          rows 2Z:2Z+2H    -> W_h_all
    #          rows 2Z+2H:2Z+4H -> W_out    (fwd cols 0:F, bwd cols bwd_col:+F)
    # b_ref: [3, 6H] packed bias slab
    #          row 0 -> [b_r | b_z | b_n_ih]   (b_ih + b_hh folded for r/z)
    #          row 1 -> [b_n_hh | 0]
    #          row 2 -> [b_out | 0]
    # o_ref: [B*Tf, F] batch-major prediction slab

    # --- in-kernel preprocessing: packed [x_t | x_{Tf-1-t}] rows -------------
    steps = [x_ref[:, i, :] for i in range(Tf)]                    # each [B, Z]
    x2 = jnp.concatenate(
        [jnp.concatenate([steps[i], steps[Tf - 1 - i]], axis=1)
         for i in range(Tf)], axis=0)                              # [Tf*B, 2Z]

    # --- parameter views / small hoists --------------------------------------
    wh = w_ref[2 * Z:2 * Z + 2 * H, :]                             # [2H, 6H]
    b_i = b_ref[0:1, :]                                            # [1, 6H]
    b_nh = jnp.broadcast_to(b_ref[1:2, 0:2 * H], (B, 2 * H))       # [B, 2H]
    b_o = b_ref[2:3, 0:F]                                          # [1, F]

    # --- hoisted input projection: ONE matmul for all gates/steps/directions -
    gi = jnp.dot(x2, w_ref[0:2 * Z, :],
                 preferred_element_type=jnp.float32) + b_i         # [Tf*B, 6H]
    gi_steps = [gi[i * B:(i + 1) * B, :] for i in range(Tf)]       # off the chain

    # --- packed recurrence: h = [h_fwd | h_bwd], PyTorch default h0 = 0 ------
    h = jnp.zeros((B, 2 * H), jnp.float32)
    hs = []
    for i in range(Tf):                                            # static unroll
        gh = jnp.dot(h, wh, preferred_element_type=jnp.float32)    # [B, 6H]
        g_rz = gi_steps[i][:, :4 * H] + gh[:, :4 * H]
        r = jax.nn.sigmoid(g_rz[:, :2 * H])
        z = jax.nn.sigmoid(g_rz[:, 2 * H:])
        n = jnp.tanh(gi_steps[i][:, 4 * H:] + r * (gh[:, 4 * H:] + b_nh))
        h = (1.0 - z) * n + z * h
        hs.append(h)
    # hs[i]: fwd hidden at time i (lanes 0:H) | bwd hidden at time Tf-1-i (H:2H)

    # --- output projection: ONE matmul over all timesteps --------------------
    HS = jnp.concatenate(hs, axis=0)                               # [Tf*B, 2H]
    P = jnp.dot(HS, w_ref[2 * Z + 2 * H:2 * Z + 4 * H, :],
                preferred_element_type=jnp.float32)                # [Tf*B, 6H]
    Pf = P[:, 0:F]                                                 # fwd @ its time
    Pb = P[:, bwd_col:bwd_col + F]                                 # bwd @ (Tf-1-t)

    # --- realign bwd in time + emit batch-major [B*Tf, F] slab ---------------
    out_rows = []
    for b in range(B):
        for t in range(Tf):
            rf = t * B + b                 # fwd hidden of time t
            rb = (Tf - 1 - t) * B + b      # row whose bwd half is time t
            out_rows.append(Pf[rf:rf + 1, :] + Pb[rb:rb + 1, :])
    pred = jnp.concatenate(out_rows, axis=0) + b_o                 # [B*Tf, F]
    o_ref[...] = pred.astype(o_ref.dtype)


# ----------------------------------------------------------------------------
# Parameter init (PyTorch layout) and one-time kernel-layout preparation
# ----------------------------------------------------------------------------
def _uniform(key, shape, scale):
    return jax.random.uniform(key, shape, jnp.float32, -scale, scale)


def init_params(key, Z, H, F):
    """PyTorch-layout parameters for nn.GRU(bidirectional) + nn.Linear."""
    k = 1.0 / math.sqrt(H)
    ks = jax.random.split(key, 10)
    p = {
        "w_ih_f": _uniform(ks[0], (3 * H, Z), k),
        "w_hh_f": _uniform(ks[1], (3 * H, H), k),
        "b_ih_f": _uniform(ks[2], (3 * H,), k),
        "b_hh_f": _uniform(ks[3], (3 * H,), k),
        "w_ih_b": _uniform(ks[4], (3 * H, Z), k),
        "w_hh_b": _uniform(ks[5], (3 * H, H), k),
        "b_ih_b": _uniform(ks[6], (3 * H,), k),
        "b_hh_b": _uniform(ks[7], (3 * H,), k),
    }
    kl = 1.0 / math.sqrt(2 * H)
    p["w_out"] = _uniform(ks[8], (F, 2 * H), kl)
    p["b_out"] = _uniform(ks[9], (F,), kl)
    return p


def _block_diag(a, b):
    pa, qa = a.shape
    pb, qb = b.shape
    top = jnp.concatenate([a, jnp.zeros((pa, qb), a.dtype)], axis=1)
    bot = jnp.concatenate([jnp.zeros((pb, qa), b.dtype), b], axis=1)
    return jnp.concatenate([top, bot], axis=0)


def prepare_params(p, H, F):
    """Pack all weights/biases ONCE into two kernel-layout slabs."""
    Z = p["w_ih_f"].shape[1]
    f32 = lambda a: a.astype(jnp.float32)

    def gates(w):  # PyTorch gate order: r, z, n
        return w[:H], w[H:2 * H], w[2 * H:3 * H]

    wir_f, wiz_f, win_f = gates(p["w_ih_f"])
    wir_b, wiz_b, win_b = gates(p["w_ih_b"])
    whr_f, whz_f, whn_f = gates(p["w_hh_f"])
    whr_b, whz_b, whn_b = gates(p["w_hh_b"])
    bir_f, biz_f, bin_f = gates(p["b_ih_f"])
    bir_b, biz_b, bin_b = gates(p["b_ih_b"])
    bhr_f, bhz_f, bhn_f = gates(p["b_hh_f"])
    bhr_b, bhz_b, bhn_b = gates(p["b_hh_b"])

    # Input / hidden gate weights, both directions lane-packed per gate.
    Wi = jnp.concatenate([_block_diag(wir_f.T, wir_b.T),
                          _block_diag(wiz_f.T, wiz_b.T),
                          _block_diag(win_f.T, win_b.T)], axis=1)   # [2Z, 6H]
    Wh = jnp.concatenate([_block_diag(whr_f.T, whr_b.T),
                          _block_diag(whz_f.T, whz_b.T),
                          _block_diag(whn_f.T, whn_b.T)], axis=1)   # [2H, 6H]

    # Output linear: fwd block in cols 0:F, bwd block in cols bwd_col:+F.
    w_out = p["w_out"]                                              # [F, 2H]
    bwd_col = _bwd_out_col(H, F)
    assert bwd_col + F <= 6 * H
    Wo = jnp.zeros((2 * H, 6 * H), jnp.float32)
    Wo = Wo.at[:H, :F].set(w_out[:, :H].T)
    Wo = Wo.at[H:, bwd_col:bwd_col + F].set(w_out[:, H:].T)

    W = jnp.concatenate([f32(Wi), f32(Wh), Wo], axis=0)             # [2Z+4H, 6H]

    b_row0 = jnp.concatenate([bir_f + bhr_f, bir_b + bhr_b,
                              biz_f + bhz_f, biz_b + bhz_b,
                              bin_f, bin_b])                        # [6H]
    b_row1 = jnp.concatenate([bhn_f, bhn_b,
                              jnp.zeros((4 * H,), jnp.float32)])    # [6H]
    b_row2 = jnp.concatenate([p["b_out"],
                              jnp.zeros((6 * H - F,), jnp.float32)])  # [6H]
    Bslab = jnp.stack([b_row0, b_row1, b_row2], axis=0)             # [3, 6H]

    del Z  # Z is re-derived from the input shape in the wrapper
    return {"w": f32(W), "b": f32(Bslab)}


# ----------------------------------------------------------------------------
# Forward wrapper (single pallas_call; wrapper does only a free reshape)
# ----------------------------------------------------------------------------
def decoder_future_forward(inputs, prep, *, future_steps, num_features):
    B, T, Z = inputs.shape
    Tf = int(future_steps)
    F = int(num_features)
    assert T >= Tf, "inputs.shape[1] must be >= future_steps"
    H = prep["w"].shape[1] // 6
    bwd_col = _bwd_out_col(H, F)

    kernel = functools.partial(_decoder_future_kernel, Tf, B, Z, H, F, bwd_col)
    out2d = pl.pallas_call(
        kernel,
        out_shape=jax.ShapeDtypeStruct((B * Tf, F), jnp.float32),
        in_specs=[VMEM_SPEC, VMEM_SPEC, VMEM_SPEC],
        out_specs=VMEM_SPEC,
    )(inputs.astype(jnp.float32), prep["w"], prep["b"])

    return out2d.reshape(B, Tf, F)        # contiguous reshape (no data movement)


# ----------------------------------------------------------------------------
# Pure-JAX reference (PyTorch GRU semantics) for correctness checking
# ----------------------------------------------------------------------------
def _reference_forward(inputs, p, future_steps):
    x = inputs[:, :future_steps, :].astype(jnp.float32)
    B, Tf, Z = x.shape
    H = p["w_hh_f"].shape[1]

    def run_dir(xs, w_ih, w_hh, b_ih, b_hh):
        def step(h, x_t):
            gi = x_t @ w_ih.T + b_ih
            gh = h @ w_hh.T + b_hh
            r = jax.nn.sigmoid(gi[:, :H] + gh[:, :H])
            z = jax.nn.sigmoid(gi[:, H:2 * H] + gh[:, H:2 * H])
            n = jnp.tanh(gi[:, 2 * H:] + r * gh[:, 2 * H:])
            h_new = (1.0 - z) * n + z * h
            return h_new, h_new
        h0 = jnp.zeros((B, H), jnp.float32)
        _, outs = jax.lax.scan(step, h0, xs)
        return outs                                          # [Tf, B, H]

    x_tm = jnp.transpose(x, (1, 0, 2))
    out_f = run_dir(x_tm, p["w_ih_f"], p["w_hh_f"], p["b_ih_f"], p["b_hh_f"])
    out_b = run_dir(x_tm[::-1], p["w_ih_b"], p["w_hh_b"], p["b_ih_b"], p["b_hh_b"])[::-1]
    dec = jnp.concatenate([out_f, out_b], axis=-1)           # [Tf, B, 2H]
    pred = dec @ p["w_out"].T + p["b_out"]
    return jnp.transpose(pred, (1, 0, 2))                    # [B, Tf, F]


# ----------------------------------------------------------------------------
if __name__ == "__main__":
    # Shapes consistent with VAME: TEMPORAL_WINDOW=16 -> seq_len=8 latents,
    # ZDIMS=16, FUTURE_STEPS=4, hidden_size_pred=32, NUM_FEATURES=12.
    B, T, Z, H, F, FUTURE_STEPS = 2, 8, 16, 32, 12, 4

    key = jax.random.PRNGKey(0)
    k_data, k_params = jax.random.split(key)
    inputs = jax.random.normal(k_data, (B, T, Z), jnp.float32)

    params = init_params(k_params, Z, H, F)
    prep = prepare_params(params, H, F)      # one-time weight repacking

    fwd = jax.jit(functools.partial(decoder_future_forward,
                                    future_steps=FUTURE_STEPS,
                                    num_features=F))
    prediction = fwd(inputs, prep)
    jax.block_until_ready(prediction)

    assert prediction.shape == (B, FUTURE_STEPS, F)

    ref = _reference_forward(inputs, params, FUTURE_STEPS)
    assert bool(jnp.all(jnp.isfinite(prediction)))
    assert bool(jnp.allclose(prediction, ref, atol=2e-3, rtol=2e-3))

    print("KERNEL_OK")
</pallas_src>

<mosaic_0001>
module attributes {stable_mosaic.version = 11 : i64} {
  func.func @_decoder_future_kernel(%arg0: memref<2x8x16xf32, #tpu.memory_space<vmem>>, %arg1: memref<160x192xf32, #tpu.memory_space<vmem>>, %arg2: memref<3x192xf32, #tpu.memory_space<vmem>>, %arg3: memref<8x12xf32, #tpu.memory_space<vmem>>) attributes {dimension_semantics = [], scalar_prefetch = 0 : i64, scratch_operands = 0 : i64, tpu.core_type = #tpu.core_type<tc>} {
    %c0 = arith.constant 0 : index
    %c0_0 = arith.constant 0 : index
    %c0_1 = arith.constant 0 : index
    %0 = vector.load %arg0[%c0, %c0_0, %c0_1] : memref<2x8x16xf32, #tpu.memory_space<vmem>>, vector<2x1x16xf32>
    %1 = vector.shape_cast %0 : vector<2x1x16xf32> to vector<2x16xf32>
    %c0_2 = arith.constant 0 : index
    %c1 = arith.constant 1 : index
    %c0_3 = arith.constant 0 : index
    %2 = vector.load %arg0[%c0_2, %c1, %c0_3] : memref<2x8x16xf32, #tpu.memory_space<vmem>>, vector<2x1x16xf32>
    %3 = vector.shape_cast %2 : vector<2x1x16xf32> to vector<2x16xf32>
    %c0_4 = arith.constant 0 : index
    %c2 = arith.constant 2 : index
    %c0_5 = arith.constant 0 : index
    %4 = vector.load %arg0[%c0_4, %c2, %c0_5] : memref<2x8x16xf32, #tpu.memory_space<vmem>>, vector<2x1x16xf32>
    %5 = vector.shape_cast %4 : vector<2x1x16xf32> to vector<2x16xf32>
    %c0_6 = arith.constant 0 : index
    %c3 = arith.constant 3 : index
    %c0_7 = arith.constant 0 : index
    %6 = vector.load %arg0[%c0_6, %c3, %c0_7] : memref<2x8x16xf32, #tpu.memory_space<vmem>>, vector<2x1x16xf32>
    %7 = vector.shape_cast %6 : vector<2x1x16xf32> to vector<2x16xf32>
    %8 = tpu.concatenate %1, %7 in 1 : vector<2x16xf32>, vector<2x16xf32> -> vector<2x32xf32>
    %9 = tpu.concatenate %3, %5 in 1 : vector<2x16xf32>, vector<2x16xf32> -> vector<2x32xf32>
    %10 = tpu.concatenate %5, %3 in 1 : vector<2x16xf32>, vector<2x16xf32> -> vector<2x32xf32>
    %11 = tpu.concatenate %7, %1 in 1 : vector<2x16xf32>, vector<2x16xf32> -> vector<2x32xf32>
    %12 = tpu.concatenate %8, %9, %10, %11 in 0 : vector<2x32xf32>, vector<2x32xf32>, vector<2x32xf32>, vector<2x32xf32> -> vector<8x32xf32>
    %c32 = arith.constant 32 : index
    %c0_8 = arith.constant 0 : index
    %13 = vector.load %arg1[%c32, %c0_8] : memref<160x192xf32, #tpu.memory_space<vmem>>, vector<64x192xf32>
    %c0_9 = arith.constant 0 : index
    %c0_10 = arith.constant 0 : index
    %14 = vector.load %arg2[%c0_9, %c0_10] : memref<3x192xf32, #tpu.memory_space<vmem>>, vector<1x192xf32>
    %c1_11 = arith.constant 1 : index
    %c0_12 = arith.constant 0 : index
    %15 = vector.load %arg2[%c1_11, %c0_12] : memref<3x192xf32, #tpu.memory_space<vmem>>, vector<1x64xf32>
    %16 = vector.shape_cast %15 : vector<1x64xf32> to vector<1x64xf32>
    %17 = vector.broadcast %16 : vector<1x64xf32> to vector<2x64xf32>
    %c2_13 = arith.constant 2 : index
    %c0_14 = arith.constant 0 : index
    %18 = vector.load %arg2[%c2_13, %c0_14] : memref<3x192xf32, #tpu.memory_space<vmem>>, vector<1x12xf32>
    %c0_15 = arith.constant 0 : index
    %c0_16 = arith.constant 0 : index
    %19 = vector.load %arg1[%c0_15, %c0_16] : memref<160x192xf32, #tpu.memory_space<vmem>>, vector<32x192xf32>
    %cst = arith.constant dense<0.000000e+00> : vector<8x192xf32>
    %20 = tpu.matmul %12, %19, %cst {dimension_numbers = #tpu.dot_dimension_numbers<[1], [0], [0], [1], [0, 0, 1, 1], [], []>} : vector<8x32xf32>, vector<32x192xf32>, vector<8x192xf32> -> vector<8x192xf32>
    %21 = vector.broadcast %14 : vector<1x192xf32> to vector<8x192xf32>
    %22 = arith.addf %20, %21 : vector<8x192xf32>
    %23 = vector.extract_strided_slice %22 {offsets = [0, 0], sizes = [2, 192], strides = [1, 1]} : vector<8x192xf32> to vector<2x192xf32>
    %24 = vector.extract_strided_slice %22 {offsets = [2, 0], sizes = [2, 192], strides = [1, 1]} : vector<8x192xf32> to vector<2x192xf32>
    %25 = vector.extract_strided_slice %22 {offsets = [4, 0], sizes = [2, 192], strides = [1, 1]} : vector<8x192xf32> to vector<2x192xf32>
    %26 = vector.extract_strided_slice %22 {offsets = [6, 0], sizes = [2, 192], strides = [1, 1]} : vector<8x192xf32> to vector<2x192xf32>
    %cst_17 = arith.constant 0.000000e+00 : f32
    %27 = vector.broadcast %cst_17 : f32 to vector<2x64xf32>
    %cst_18 = arith.constant dense<0.000000e+00> : vector<2x192xf32>
    %28 = tpu.matmul %27, %13, %cst_18 {dimension_numbers = #tpu.dot_dimension_numbers<[1], [0], [0], [1], [0, 0, 1, 1], [], []>} : vector<2x64xf32>, vector<64x192xf32>, vector<2x192xf32> -> vector<2x192xf32>
    %29 = vector.extract_strided_slice %23 {offsets = [0, 0], sizes = [2, 128], strides = [1, 1]} : vector<2x192xf32> to vector<2x128xf32>
    %30 = vector.extract_strided_slice %28 {offsets = [0, 0], sizes = [2, 128], strides = [1, 1]} : vector<2x192xf32> to vector<2x128xf32>
    %31 = arith.addf %29, %30 : vector<2x128xf32>
    %32 = vector.extract_strided_slice %31 {offsets = [0, 0], sizes = [2, 64], strides = [1, 1]} : vector<2x128xf32> to vector<2x64xf32>
    %33 = arith.negf %32 : vector<2x64xf32>
    %34 = math.exp %33 : vector<2x64xf32>
    %cst_19 = arith.constant 1.000000e+00 : f32
    %35 = vector.broadcast %cst_19 : f32 to vector<2x64xf32>
    %36 = arith.addf %35, %34 : vector<2x64xf32>
    %37 = arith.divf %35, %36 : vector<2x64xf32>
    %38 = vector.extract_strided_slice %31 {offsets = [0, 64], sizes = [2, 64], strides = [1, 1]} : vector<2x128xf32> to vector<2x64xf32>
    %39 = arith.negf %38 : vector<2x64xf32>
    %40 = math.exp %39 : vector<2x64xf32>
    %cst_20 = arith.constant 1.000000e+00 : f32
    %41 = vector.broadcast %cst_20 : f32 to vector<2x64xf32>
    %42 = arith.addf %41, %40 : vector<2x64xf32>
    %43 = arith.divf %41, %42 : vector<2x64xf32>
    %44 = vector.extract_strided_slice %23 {offsets = [0, 128], sizes = [2, 64], strides = [1, 1]} : vector<2x192xf32> to vector<2x64xf32>
    %45 = vector.extract_strided_slice %28 {offsets = [0, 128], sizes = [2, 64], strides = [1, 1]} : vector<2x192xf32> to vector<2x64xf32>
    %46 = arith.addf %45, %17 : vector<2x64xf32>
    %47 = arith.mulf %37, %46 : vector<2x64xf32>
    %48 = arith.addf %44, %47 : vector<2x64xf32>
    %49 = math.tanh %48 : vector<2x64xf32>
    %cst_21 = arith.constant 1.000000e+00 : f32
    %50 = vector.broadcast %cst_21 : f32 to vector<2x64xf32>
    %51 = arith.subf %50, %43 : vector<2x64xf32>
    %52 = arith.mulf %51, %49 : vector<2x64xf32>
    %53 = arith.mulf %43, %27 : vector<2x64xf32>
    %54 = arith.addf %52, %53 : vector<2x64xf32>
    %cst_22 = arith.constant dense<0.000000e+00> : vector<2x192xf32>
    %55 = tpu.matmul %54, %13, %cst_22 {dimension_numbers = #tpu.dot_dimension_numbers<[1], [0], [0], [1], [0, 0, 1, 1], [], []>} : vector<2x64xf32>, vector<64x192xf32>, vector<2x192xf32> -> vector<2x192xf32>
    %56 = vector.extract_strided_slice %24 {offsets = [0, 0], sizes = [2, 128], strides = [1, 1]} : vector<2x192xf32> to vector<2x128xf32>
    %57 = vector.extract_strided_slice %55 {offsets = [0, 0], sizes = [2, 128], strides = [1, 1]} : vector<2x192xf32> to vector<2x128xf32>
    %58 = arith.addf %56, %57 : vector<2x128xf32>
    %59 = vector.extract_strided_slice %58 {offsets = [0, 0], sizes = [2, 64], strides = [1, 1]} : vector<2x128xf32> to vector<2x64xf32>
    %60 = arith.negf %59 : vector<2x64xf32>
    %61 = math.exp %60 : vector<2x64xf32>
    %cst_23 = arith.constant 1.000000e+00 : f32
    %62 = vector.broadcast %cst_23 : f32 to vector<2x64xf32>
    %63 = arith.addf %62, %61 : vector<2x64xf32>
    %64 = arith.divf %62, %63 : vector<2x64xf32>
    %65 = vector.extract_strided_slice %58 {offsets = [0, 64], sizes = [2, 64], strides = [1, 1]} : vector<2x128xf32> to vector<2x64xf32>
    %66 = arith.negf %65 : vector<2x64xf32>
    %67 = math.exp %66 : vector<2x64xf32>
    %cst_24 = arith.constant 1.000000e+00 : f32
    %68 = vector.broadcast %cst_24 : f32 to vector<2x64xf32>
    %69 = arith.addf %68, %67 : vector<2x64xf32>
    %70 = arith.divf %68, %69 : vector<2x64xf32>
    %71 = vector.extract_strided_slice %24 {offsets = [0, 128], sizes = [2, 64], strides = [1, 1]} : vector<2x192xf32> to vector<2x64xf32>
    %72 = vector.extract_strided_slice %55 {offsets = [0, 128], sizes = [2, 64], strides = [1, 1]} : vector<2x192xf32> to vector<2x64xf32>
    %73 = arith.addf %72, %17 : vector<2x64xf32>
    %74 = arith.mulf %64, %73 : vector<2x64xf32>
    %75 = arith.addf %71, %74 : vector<2x64xf32>
    %76 = math.tanh %75 : vector<2x64xf32>
    %cst_25 = arith.constant 1.000000e+00 : f32
    %77 = vector.broadcast %cst_25 : f32 to vector<2x64xf32>
    %78 = arith.subf %77, %70 : vector<2x64xf32>
    %79 = arith.mulf %78, %76 : vector<2x64xf32>
    %80 = arith.mulf %70, %54 : vector<2x64xf32>
    %81 = arith.addf %79, %80 : vector<2x64xf32>
    %cst_26 = arith.constant dense<0.000000e+00> : vector<2x192xf32>
    %82 = tpu.matmul %81, %13, %cst_26 {dimension_numbers = #tpu.dot_dimension_numbers<[1], [0], [0], [1], [0, 0, 1, 1], [], []>} : vector<2x64xf32>, vector<64x192xf32>, vector<2x192xf32> -> vector<2x192xf32>
    %83 = vector.extract_strided_slice %25 {offsets = [0, 0], sizes = [2, 128], strides = [1, 1]} : vector<2x192xf32> to vector<2x128xf32>
    %84 = vector.extract_strided_slice %82 {offsets = [0, 0], sizes = [2, 128], strides = [1, 1]} : vector<2x192xf32> to vector<2x128xf32>
    %85 = arith.addf %83, %84 : vector<2x128xf32>
    %86 = vector.extract_strided_slice %85 {offsets = [0, 0], sizes = [2, 64], strides = [1, 1]} : vector<2x128xf32> to vector<2x64xf32>
    %87 = arith.negf %86 : vector<2x64xf32>
    %88 = math.exp %87 : vector<2x64xf32>
    %cst_27 = arith.constant 1.000000e+00 : f32
    %89 = vector.broadcast %cst_27 : f32 to vector<2x64xf32>
    %90 = arith.addf %89, %88 : vector<2x64xf32>
    %91 = arith.divf %89, %90 : vector<2x64xf32>
    %92 = vector.extract_strided_slice %85 {offsets = [0, 64], sizes = [2, 64], strides = [1, 1]} : vector<2x128xf32> to vector<2x64xf32>
    %93 = arith.negf %92 : vector<2x64xf32>
    %94 = math.exp %93 : vector<2x64xf32>
    %cst_28 = arith.constant 1.000000e+00 : f32
    %95 = vector.broadcast %cst_28 : f32 to vector<2x64xf32>
    %96 = arith.addf %95, %94 : vector<2x64xf32>
    %97 = arith.divf %95, %96 : vector<2x64xf32>
    %98 = vector.extract_strided_slice %25 {offsets = [0, 128], sizes = [2, 64], strides = [1, 1]} : vector<2x192xf32> to vector<2x64xf32>
    %99 = vector.extract_strided_slice %82 {offsets = [0, 128], sizes = [2, 64], strides = [1, 1]} : vector<2x192xf32> to vector<2x64xf32>
    %100 = arith.addf %99, %17 : vector<2x64xf32>
    %101 = arith.mulf %91, %100 : vector<2x64xf32>
    %102 = arith.addf %98, %101 : vector<2x64xf32>
    %103 = math.tanh %102 : vector<2x64xf32>
    %cst_29 = arith.constant 1.000000e+00 : f32
    %104 = vector.broadcast %cst_29 : f32 to vector<2x64xf32>
    %105 = arith.subf %104, %97 : vector<2x64xf32>
    %106 = arith.mulf %105, %103 : vector<2x64xf32>
    %107 = arith.mulf %97, %81 : vector<2x64xf32>
    %108 = arith.addf %106, %107 : vector<2x64xf32>
    %cst_30 = arith.constant dense<0.000000e+00> : vector<2x192xf32>
    %109 = tpu.matmul %108, %13, %cst_30 {dimension_numbers = #tpu.dot_dimension_numbers<[1], [0], [0], [1], [0, 0, 1, 1], [], []>} : vector<2x64xf32>, vector<64x192xf32>, vector<2x192xf32> -> vector<2x192xf32>
    %110 = vector.extract_strided_slice %26 {offsets = [0, 0], sizes = [2, 128], strides = [1, 1]} : vector<2x192xf32> to vector<2x128xf32>
    %111 = vector.extract_strided_slice %109 {offsets = [0, 0], sizes = [2, 128], strides = [1, 1]} : vector<2x192xf32> to vector<2x128xf32>
    %112 = arith.addf %110, %111 : vector<2x128xf32>
    %113 = vector.extract_strided_slice %112 {offsets = [0, 0], sizes = [2, 64], strides = [1, 1]} : vector<2x128xf32> to vector<2x64xf32>
    %114 = arith.negf %113 : vector<2x64xf32>
    %115 = math.exp %114 : vector<2x64xf32>
    %cst_31 = arith.constant 1.000000e+00 : f32
    %116 = vector.broadcast %cst_31 : f32 to vector<2x64xf32>
    %117 = arith.addf %116, %115 : vector<2x64xf32>
    %118 = arith.divf %116, %117 : vector<2x64xf32>
    %119 = vector.extract_strided_slice %112 {offsets = [0, 64], sizes = [2, 64], strides = [1, 1]} : vector<2x128xf32> to vector<2x64xf32>
    %120 = arith.negf %119 : vector<2x64xf32>
    %121 = math.exp %120 : vector<2x64xf32>
    %cst_32 = arith.constant 1.000000e+00 : f32
    %122 = vector.broadcast %cst_32 : f32 to vector<2x64xf32>
    %123 = arith.addf %122, %121 : vector<2x64xf32>
    %124 = arith.divf %122, %123 : vector<2x64xf32>
    %125 = vector.extract_strided_slice %26 {offsets = [0, 128], sizes = [2, 64], strides = [1, 1]} : vector<2x192xf32> to vector<2x64xf32>
    %126 = vector.extract_strided_slice %109 {offsets = [0, 128], sizes = [2, 64], strides = [1, 1]} : vector<2x192xf32> to vector<2x64xf32>
    %127 = arith.addf %126, %17 : vector<2x64xf32>
    %128 = arith.mulf %118, %127 : vector<2x64xf32>
    %129 = arith.addf %125, %128 : vector<2x64xf32>
    %130 = math.tanh %129 : vector<2x64xf32>
    %cst_33 = arith.constant 1.000000e+00 : f32
    %131 = vector.broadcast %cst_33 : f32 to vector<2x64xf32>
    %132 = arith.subf %131, %124 : vector<2x64xf32>
    %133 = arith.mulf %132, %130 : vector<2x64xf32>
    %134 = arith.mulf %124, %108 : vector<2x64xf32>
    %135 = arith.addf %133, %134 : vector<2x64xf32>
    %136 = tpu.concatenate %54, %81, %108, %135 in 0 : vector<2x64xf32>, vector<2x64xf32>, vector<2x64xf32>, vector<2x64xf32> -> vector<8x64xf32>
    %c96 = arith.constant 96 : index
    %c0_34 = arith.constant 0 : index
    %137 = vector.load %arg1[%c96, %c0_34] : memref<160x192xf32, #tpu.memory_space<vmem>>, vector<64x192xf32>
    %cst_35 = arith.constant dense<0.000000e+00> : vector<8x192xf32>
    %138 = tpu.matmul %136, %137, %cst_35 {dimension_numbers = #tpu.dot_dimension_numbers<[1], [0], [0], [1], [0, 0, 1, 1], [], []>} : vector<8x64xf32>, vector<64x192xf32>, vector<8x192xf32> -> vector<8x192xf32>
    %139 = vector.extract_strided_slice %138 {offsets = [0, 0], sizes = [8, 12], strides = [1, 1]} : vector<8x192xf32> to vector<8x12xf32>
    %140 = vector.extract_strided_slice %138 {offsets = [0, 128], sizes = [8, 12], strides = [1, 1]} : vector<8x192xf32> to vector<8x12xf32>
    %141 = vector.extract_strided_slice %139 {offsets = [0, 0], sizes = [1, 12], strides = [1, 1]} : vector<8x12xf32> to vector<1x12xf32>
    %142 = vector.extract_strided_slice %140 {offsets = [6, 0], sizes = [1, 12], strides = [1, 1]} : vector<8x12xf32> to vector<1x12xf32>
    %143 = arith.addf %141, %142 : vector<1x12xf32>
    %144 = vector.extract_strided_slice %139 {offsets = [2, 0], sizes = [1, 12], strides = [1, 1]} : vector<8x12xf32> to vector<1x12xf32>
    %145 = vector.extract_strided_slice %140 {offsets = [4, 0], sizes = [1, 12], strides = [1, 1]} : vector<8x12xf32> to vector<1x12xf32>
    %146 = arith.addf %144, %145 : vector<1x12xf32>
    %147 = vector.extract_strided_slice %139 {offsets = [4, 0], sizes = [1, 12], strides = [1, 1]} : vector<8x12xf32> to vector<1x12xf32>
    %148 = vector.extract_strided_slice %140 {offsets = [2, 0], sizes = [1, 12], strides = [1, 1]} : vector<8x12xf32> to vector<1x12xf32>
    %149 = arith.addf %147, %148 : vector<1x12xf32>
    %150 = vector.extract_strided_slice %139 {offsets = [6, 0], sizes = [1, 12], strides = [1, 1]} : vector<8x12xf32> to vector<1x12xf32>
    %151 = vector.extract_strided_slice %140 {offsets = [0, 0], sizes = [1, 12], strides = [1, 1]} : vector<8x12xf32> to vector<1x12xf32>
    %152 = arith.addf %150, %151 : vector<1x12xf32>
    %153 = vector.extract_strided_slice %139 {offsets = [1, 0], sizes = [1, 12], strides = [1, 1]} : vector<8x12xf32> to vector<1x12xf32>
    %154 = vector.extract_strided_slice %140 {offsets = [7, 0], sizes = [1, 12], strides = [1, 1]} : vector<8x12xf32> to vector<1x12xf32>
    %155 = arith.addf %153, %154 : vector<1x12xf32>
    %156 = vector.extract_strided_slice %139 {offsets = [3, 0], sizes = [1, 12], strides = [1, 1]} : vector<8x12xf32> to vector<1x12xf32>
    %157 = vector.extract_strided_slice %140 {offsets = [5, 0], sizes = [1, 12], strides = [1, 1]} : vector<8x12xf32> to vector<1x12xf32>
    %158 = arith.addf %156, %157 : vector<1x12xf32>
    %159 = vector.extract_strided_slice %139 {offsets = [5, 0], sizes = [1, 12], strides = [1, 1]} : vector<8x12xf32> to vector<1x12xf32>
    %160 = vector.extract_strided_slice %140 {offsets = [3, 0], sizes = [1, 12], strides = [1, 1]} : vector<8x12xf32> to vector<1x12xf32>
    %161 = arith.addf %159, %160 : vector<1x12xf32>
    %162 = vector.extract_strided_slice %139 {offsets = [7, 0], sizes = [1, 12], strides = [1, 1]} : vector<8x12xf32> to vector<1x12xf32>
    %163 = vector.extract_strided_slice %140 {offsets = [1, 0], sizes = [1, 12], strides = [1, 1]} : vector<8x12xf32> to vector<1x12xf32>
    %164 = arith.addf %162, %163 : vector<1x12xf32>
    %165 = tpu.concatenate %143, %146, %149, %152, %155, %158, %161, %164 in 0 : vector<1x12xf32>, vector<1x12xf32>, vector<1x12xf32>, vector<1x12xf32>, vector<1x12xf32>, vector<1x12xf32>, vector<1x12xf32>, vector<1x12xf32> -> vector<8x12xf32>
    %166 = vector.broadcast %18 : vector<1x12xf32> to vector<8x12xf32>
    %167 = arith.addf %165, %166 : vector<8x12xf32>
    %c0_36 = arith.constant 0 : index
    %c0_37 = arith.constant 0 : index
    %168 = vector.load %arg3[%c0_36, %c0_37] : memref<8x12xf32, #tpu.memory_space<vmem>>, vector<8x12xf32>
    tpu.vector_store %arg3[%c0_36, %c0_37], %167 {strides = array<i32>} : memref<8x12xf32, #tpu.memory_space<vmem>>, vector<8x12xf32>,
    return
  }
}

</mosaic_0001>

<bundles_post_ra>
// kernel: decoder_future_forward.1
= control target key start
LH: loop header
LB: loop body
LE: loop exit
PB: predicated region body
PF: predicated region fallthrough
CT: control target
= control target key end

     0   :  { %8 = vsyncpa [#allocation3], 0  ;;  %s995_s0 = inlined_call_operand.hbm [shape: f32[2,8,16], index: 0, kind: input, shape index: {}]   ;;  %s996_s1 = inlined_call_operand.hbm [shape: f32[160,192], index: 1, kind: input, shape index: {}]   ;;  %s997_s2 = inlined_call_operand.hbm [shape: f32[3,192], index: 2, kind: input, shape index: {}]   ;;  %s998_s3 = inlined_call_operand.hbm [shape: f32[8,12], index: 3, kind: output, shape index: {}]  }
   0x1   :  { %9 = vsyncpa [#allocation6], 0  ;;  %s28_s14 = sshll.u32 %s996_s1, 4  ;;  %s29_s14 = int_to_ptr.hbm [resolvable:$true] %s28_s14 }
   0x2   :  { %10 = vsyncpa [#allocation4], 0  ;;  %s801_s15 = smov [#allocation5]   ;;  %s15_s19 = sshll.u32 %s995_s0, 4  ;;  %s16_s19 = int_to_ptr.hbm [resolvable:$true] %s15_s19 }
   0x3   :  { %s30_s16 = sshll.u32 %s801_s15, 4  ;;  %s802_s20 = smov 256   ;;  %s31_s16 = int_to_ptr.vmem [resolvable:$true] %s30_s16 }
   0x4   :  { %s803_s21 = smov 16   ;;  %s804_s22 = smov [#allocation2]  }
   0x5   :  { %36 = dma.hbm_to_vmem [thread:$0]  %s29_s14, 5120, %s31_s16, [#allocation6], %s802_s20, %s802_s20, %s803_s21  }
   0x6   :  { %s17_s23 = sshll.u32 %s804_s22, 4  ;;  %s805_s24 = smov 128   ;;  %s18_s23 = int_to_ptr.vmem [resolvable:$true] %s17_s23 }
   0x7   :  { %s806_s25 = smov 8   ;;  %s42_s27 = sshll.u32 %s997_s2, 4  ;;  %s43_s27 = int_to_ptr.hbm [resolvable:$true] %s42_s27 }
   0x8   :  { %23 = dma.hbm_to_vmem [thread:$0]  %s16_s19, 256, %s18_s23, [#allocation3], %s805_s24, %s805_s24, %s806_s25  }
   0x9   :  { %s807_s28 = smov [#allocation7]  }
   0xa   :  { %s44_s29 = sshll.u32 %s807_s28, 4  ;;  %s45_s29 = int_to_ptr.vmem [resolvable:$true] %s44_s29 }
   0xb   :  { %47 = dma.hbm_to_vmem [thread:$0]  %s43_s27, 128, %s45_s29, [#allocation6]  }
   0xc   :  { %795 = dma.done.wait [#allocation3], 256  }
   0xd   :  { %796 = vsyncadd [#allocation3], 4294967040 }
   0xe   :  { %797 = dma.done.wait [#allocation6], 5248  }
   0xf   :  { %798 = vsyncadd [#allocation6], 4294962048  ;;  %v64_v0 = vld [vmem:[#allocation2 + $0x2] sm:$0x1]  ;;  %v65_v1 = vld [vmem:[#allocation2 + $0xa] sm:$0x1] }
  0x10   :  { %vm71_vm0 = vcmask 1041409   ;;  %v90_v2 = vrot.slane %v65_v1, 7  ;;  %v66_v3 = vld [vmem:[#allocation2 + $0x3] sm:$0x1]  ;;  %v67_v4 = vld [vmem:[#allocation2 + $0xb] sm:$0x1] }
  0x11   :  { %v841_v5 = vld [vmem:[#allocation5 + $0xb0] sm:$0xff]  ;;  %v76_v6 = vrot.slane %v67_v4, 7  ;;  %v63_v7 = vld [vmem:[#allocation2 + $0x9] sm:$0x1]  ;;  %v844_v8 = vld [vmem:[#allocation5 + $0xa0] sm:$0xff]  ;;  %v808_v30 = vmov 0.0  }
  0x12   :  { %210 = vmatpush.msra.mxu2 %v841_v5  ;;  %v847_v9 = vsel %vm71_vm0, %v90_v2, %v64_v0  ;;  %v61_v10 = vld [vmem:[#allocation2 + $0x8] sm:$0x1]  ;;  %v849_v11 = vld [vmem:[#allocation5 + $0x90] sm:$0xff]  ;;  %v85_v13 = vrot.slane %v63_v7, 7  ;;  %v870_v19 = vld [vmem:[#allocation5 + $0x80] sm:$0xff]  ;;  %vm81_vm1 = vcmask 130048  }
  0x13   :  { %92 = vrot.lane.b32.xlu0 %v847_v9, %s803_s21  ;;  %v854_v12 = vsel %vm71_vm0, %v76_v6, %v66_v3  ;;  %v62_v14 = vld [vmem:[#allocation2 + $0x1] sm:$0x1]  ;;  %v70_v15 = vrot.slane %v61_v10, 7  ;;  %v60_v16 = vld [vmem:[#allocation2] sm:$0x1]  ;;  %v876_v21 = vld [vmem:[#allocation5 + $0x60] sm:$0xff] }
  0x14   :  { %211 = vmatpush.msra.mxu2 %v844_v8  ;;  %78 = vrot.lane.b32.xlu1 %v854_v12, %s803_s21  ;;  %v861_v17 = vsel %vm71_vm0, %v85_v13, %v62_v14  ;;  %v873_v20 = vld [vmem:[#allocation5 + $0x70] sm:$0xff]  ;;  %v148_v23 = vld [vmem:[#allocation5 + $0x38] sm:$0xff]  ;;  %v145_v25 = vld [vmem:[#allocation5 + $0x20] sm:$0xff]  ;;  %vm115_vm2 = vcmask 1041408   ;;  %vm117_vm3 = vcmask 1043456   ;;  %vm119_vm4 = vcmask 1045504  }
  0x15   :  { %v864_v18 = vsel %vm71_vm0, %v70_v15, %v60_v16  ;;  %v147_v22 = vld [vmem:[#allocation5 + $0x30] sm:$0xff]  ;;  %190 = vmatpush.msra.mxu1 %v148_v23  ;;  %v146_v26 = vld [vmem:[#allocation5 + $0x28] sm:$0xff]  ;;  %v882_v27 = vld [vmem:[#allocation5 + $0x40] sm:$0xff]  ;;  %vm154_vm5 = vcmask 261120   ;;  %s809_s0 = smov 64   ;;  %vm198_vm10 = vcmask 523264  }
  0x16   :  { %212 = vmatpush.msra.mxu2 %v849_v11  ;;  %170 = vmatpush.msra.mxu0 %v147_v22  ;;  %v879_v24 = vld [vmem:[#allocation5 + $0x50] sm:$0xff]  ;;  %v144_v29 = vld [vmem:[#allocation5 + $0x18] sm:$0xff]  ;;  %v141_v31 = vld [vmem:[#allocation5] sm:$0xff]  ;;  %s810_s2 = smov [#allocation8]   ;;  %s638_s6 = sshll.u32 %s998_s3, 4  ;;  %s639_s6 = int_to_ptr.hbm [resolvable:$true] %s638_s6 }
  0x17   :  { %191 = vmatpush.msra.mxu1 %v146_v26  ;;  %v143_v28 = vld [vmem:[#allocation5 + $0x10] sm:$0xff]  ;;  %v142_v32 = vld [vmem:[#allocation5 + $0x8] sm:$0xff]  ;;  %v886_v33 = vld [vmem:[#allocation5 + $0xb8] sm:$0xff]  ;;  %s636_s30 = sshll.u32 %s810_s2, 4  ;;  %s637_s30 = int_to_ptr.vmem [resolvable:$true] %s636_s30 }
  0x18   :  { %213 = vmatpush.msra.mxu2 %v870_v19  ;;  %171 = vmatpush.msra.mxu0 %v145_v25  ;;  %v888_v34 = vld [vmem:[#allocation5 + $0xa8] sm:$0xff]  ;;  %v893_v35 = vld [vmem:[#allocation5 + $0x98] sm:$0xff]  ;;  %v137_v55 = vld [vmem:[#allocation7] ss:$4 sm:$0x3] }
  0x19   :  { %192 = vmatpush.msra.mxu1 %v144_v29  ;;  %230 = vmatpush.msra.mxu3 %v886_v33  ;;  %v899_v36 = vld [vmem:[#allocation5 + $0x88] sm:$0xff]  ;;  %v128_v37 = vld [vmem:[#allocation5 + $0x78] sm:$0xff]  ;;  %v150_v56 = vperm.slane %v137_v55, 0  ;;  %v947_v2 = vld [vmem:[#allocation7 + $0x1] ss:$0 sm:$0xff] }
  0x1a   :  { %214 = vmatpush.msra.mxu2 %v873_v20  ;;  %172 = vmatpush.msra.mxu0 %v143_v28  ;;  %v126_v38 = vld [vmem:[#allocation5 + $0x68] sm:$0xff]  ;;  %v124_v39 = vld [vmem:[#allocation5 + $0x58] sm:$0xff] }
  0x1b   :  { %97 = vrot.lane.b32.xlu0 %v861_v17, %s803_s21  ;;  %193 = vmatpush.msra.mxu1 %v142_v32  ;;  %v122_v40 = vld [vmem:[#allocation5 + $0x48] sm:$0xff] }
  0x1c   :  { %102 = vrot.lane.b32.xlu1 %v864_v18, %s803_s21  ;;  %215 = vmatpush.msra.mxu2 %v876_v21 }
  0x1d   :  { %173 = vmatpush.msra.mxu0 %v141_v31  ;;  %307 = vmatpush.msrb.mxu1 %v886_v33 }
  0x1e   :  { %216 = vmatpush.msra.mxu2 %v879_v24  ;;  %231 = vmatpush.msra.mxu3 %v888_v34 }
  0x1f   :  { %287 = vmatpush.msrb.mxu0 %v841_v5  ;;  %308 = vmatpush.msrb.mxu1 %v888_v34 }
  0x20   :  { %217 = vmatpush.msra.mxu2 %v882_v27  ;;  %232 = vmatpush.msra.mxu3 %v893_v35 }
  0x21   :  { %218 = vmatmul.f32.vlgmr.msra.gmra.mxu2 %v808_v30  ;;  %288 = vmatpush.msrb.mxu0 %v844_v8 }
  0x22   :  { %373 = vmatpush.msrb.mxu2 %v841_v5  ;;  %309 = vmatpush.msrb.mxu1 %v893_v35 }
  0x23   :  { %289 = vmatpush.msrb.mxu0 %v849_v11  ;;  %233 = vmatpush.msra.mxu3 %v899_v36 }
  0x24   :  { %374 = vmatpush.msrb.mxu2 %v844_v8  ;;  %310 = vmatpush.msrb.mxu1 %v899_v36 }
  0x25   :  { %290 = vmatpush.msrb.mxu0 %v870_v19  ;;  %234 = vmatpush.msra.mxu3 %v128_v37 }
  0x26   :  { %375 = vmatpush.msrb.mxu2 %v849_v11  ;;  %311 = vmatpush.msrb.mxu1 %v128_v37 }
  0x27   :  { %291 = vmatpush.msrb.mxu0 %v873_v20  ;;  %235 = vmatpush.msra.mxu3 %v126_v38 }
  0x28   :  { %376 = vmatpush.msrb.mxu2 %v870_v19  ;;  %312 = vmatpush.msrb.mxu1 %v126_v38 }
  0x29   :  { %292 = vmatpush.msrb.mxu0 %v876_v21  ;;  %236 = vmatpush.msra.mxu3 %v124_v39 }
  0x2a   :  { %377 = vmatpush.msrb.mxu2 %v873_v20  ;;  %313 = vmatpush.msrb.mxu1 %v124_v39 }
  0x2b   :  { %293 = vmatpush.msrb.mxu0 %v879_v24  ;;  %237 = vmatpush.msra.mxu3 %v122_v40 }
  0x2c   :  { %378 = vmatpush.msrb.mxu2 %v876_v21  ;;  %314 = vmatpush.msrb.mxu1 %v122_v40 }
  0x2d   :  { %294 = vmatpush.msrb.mxu0 %v882_v27  ;;  %238 = vmatmul.f32.vlgmr.msra.gmra.mxu3 %v808_v30 }
  0x2e   :  { %379 = vmatpush.msrb.mxu2 %v879_v24  ;;  %393 = vmatpush.msrb.mxu3 %v886_v33 }
  0x30   :  { %380 = vmatpush.msrb.mxu2 %v882_v27  ;;  %394 = vmatpush.msrb.mxu3 %v888_v34 }
  0x32   :  { %395 = vmatpush.msrb.mxu3 %v893_v35 }
  0x34   :  { %396 = vmatpush.msrb.mxu3 %v899_v36 }
  0x36   :  { %397 = vmatpush.msrb.mxu3 %v128_v37 }
  0x38   :  { %398 = vmatpush.msrb.mxu3 %v126_v38 }
  0x3a   :  { %399 = vmatpush.msrb.mxu3 %v124_v39 }
  0x3c   :  { %400 = vmatpush.msrb.mxu3 %v122_v40 }
  0x85   :  { %v93_v41 = vpop.permute.xlu0 %92 }
  0x86   :  { %v79_v42 = vpop.permute.xlu1 %78  ;;  %v95_v43 = vsel %vm81_vm1, %v861_v17, %v93_v41 }
  0x87   :  { %v107_v44 = vrot.slane %v95_v43, 6  ;;  %v82_v45 = vsel %vm81_vm1, %v864_v18, %v79_v42 }
  0x89   :  { %v116_v51 = vsel %vm115_vm2, %v82_v45, %v107_v44 }
  0x8d   :  { %v98_v46 = vpop.permute.xlu0 %97 }
  0x8e   :  { %v100_v47 = vsel %vm81_vm1, %v847_v9, %v98_v46  ;;  %v103_v48 = vpop.permute.xlu1 %102 }
  0x8f   :  { %v110_v49 = vrot.slane %v100_v47, 4  ;;  %v105_v50 = vsel %vm81_vm1, %v854_v12, %v103_v48 }
  0x90   :  { %v113_v52 = vrot.slane %v105_v50, 2 }
  0x91   :  { %v118_v53 = vsel %vm117_vm3, %v116_v51, %v110_v49 }
  0x92   :  { %v120_v54 = vsel %vm119_vm4, %v118_v53, %v113_v52 }
  0x93   :  { %649 = vmatmul.msk.f32.vlgmr.msra.gmra.mxu0 %vm154_vm5, %v120_v54  ;;  %650 = vmatmul.msk.f32.vlgmr.msra.gmra.mxu1 %vm154_vm5, %v120_v54 }
  0x94   :  { %459 = vmatpush.msra.mxu0 %v841_v5  ;;  %479 = vmatpush.msra.mxu1 %v886_v33 }
  0x96   :  { %460 = vmatpush.msra.mxu0 %v844_v8  ;;  %480 = vmatpush.msra.mxu1 %v888_v34  ;;  %v151_v8 = vperm.slane %v137_v55, 1 }
  0x98   :  { %461 = vmatpush.msra.mxu0 %v849_v11  ;;  %481 = vmatpush.msra.mxu1 %v893_v35 }
  0x9a   :  { %462 = vmatpush.msra.mxu0 %v870_v19  ;;  %482 = vmatpush.msra.mxu1 %v899_v36 }
  0x9c   :  { %463 = vmatpush.msra.mxu0 %v873_v20  ;;  %483 = vmatpush.msra.mxu1 %v128_v37 }
  0x9e   :  { %464 = vmatpush.msra.mxu0 %v876_v21  ;;  %484 = vmatpush.msra.mxu1 %v126_v38 }
  0xa0   :  { %465 = vmatpush.msra.mxu0 %v879_v24  ;;  %485 = vmatpush.msra.mxu1 %v124_v39 }
  0xa2   :  { %466 = vmatpush.msra.mxu0 %v882_v27  ;;  %486 = vmatpush.msra.mxu1 %v122_v40 }
  0xa4   :  { %v219_v58 = vpop.f32.mrf.mxu2 }
  0xb0   :  { %v239_v4 = vpop.f32.mrf.mxu3 }
  0xb1   :  { %v262_v10 = vadd.f32 %v947_v2, %v239_v4 }
 0x110   :  { %v175_v57 = vpop.f32.mrf.mxu0  ;;  %v195_v11 = vpop.f32.mrf.mxu1 }
 0x111   :  { %v944_v59 = vadd.f32 %v175_v57, %v150_v56  ;;  %v950_v15 = vadd.f32 %v195_v11, %v151_v8 }
 0x113   :  { %v242_v60 = vadd.f32 %v219_v58, %v944_v59 }
 0x115   :  { %v651_v61 = vmul.f32 -1.442695, %v242_v60 }
 0x117   :  { %675 = vpow2.f32 %v651_v61 }
 0x11d   :  { %v676_v62 = vpop.eup %675 }
 0x11e   :  { %v246_v63 = vadd.f32 1.0, %v676_v62 }
 0x120   :  { %677 = vrcp.f32 %v246_v63  ;;  %v258_v5 = vand.u32 2147483648, %v246_v63  ;;  %v256_v7 = vand.u32 2147483647, %v246_v63  ;;  %vm252_vm7 = vweird.f32 %v246_v63 }
 0x122   :  { %v259_v12 = vor.u32 1.1754944e-38, %v258_v5  ;;  %vm257_vm9 = vcmp.eq.f32.partialorder %v256_v7, 8.507059e+37 }
 0x126   :  { %v678_v0 = vpop.eup %677 }
 0x127   :  { %v248_v1 = vmul.f32 %v678_v0, %v246_v63  ;;  %vm253_vm6 = vweird.f32 %v678_v0 }
 0x128   :  { %vm254_vm8 = vmor %vm252_vm7, %vm253_vm6 }
 0x129   :  { %v249_v3 = vsub.f32 1.0, %v248_v1 }
 0x12b   :  { %v250_v6 = vmul.f32 %v678_v0, %v249_v3 }
 0x12d   :  { %v251_v9 = vadd.f32 %v678_v0, %v250_v6 }
 0x12f   :  { %v255_v13 = vsel %vm254_vm8, %v678_v0, %v251_v9 }
 0x130   :  { %v260_v14 = vsel %vm257_vm9, %v259_v12, %v255_v13 }
 0x131   :  { %v263_v16 = vmul.f32 %v262_v10, %v260_v14  ;;  %v266_v19 = vsub.f32 1.0, %v260_v14  ;;  %v272_v21 = vmul.f32 0.0, %v260_v14 }
 0x133   :  { %v264_v17 = vadd.f32 %v263_v16, %v950_v15 }
 0x135   :  { %679 = vtanh.f32 %v264_v17 }
 0x13b   :  { %v680_v18 = vpop.eup %679 }
 0x13c   :  { %268 = vrot.lane.b32.xlu2 %v680_v18, %s809_s0 }
 0x196   :  { %v269_v20 = vpop.permute.xlu2 %268 }
 0x197   :  { %v271_v22 = vmul.f32 %v269_v20, %v266_v19 }
 0x199   :  { %v954_v23 = vadd.f32 %v272_v21, %v271_v22 }
 0x19b   :  { %275 = vrot.lane.b32.xlu2 %v954_v23, %s809_s0  ;;  %v355_v48 = vrot.slane %v954_v23, 6 }
 0x1f5   :  { %v276_v24 = vpop.permute.xlu2 %275 }
 0x1f6   :  { %652 = vmatmul.msk.f32.vlgmr.msrb.gmra.mxu0 %vm198_vm10, %v276_v24  ;;  %653 = vmatmul.msk.f32.vlgmr.msrb.gmra.mxu1 %vm198_vm10, %v276_v24 }
 0x273   :  { %v296_v25 = vpop.f32.mrf.mxu0  ;;  %v316_v33 = vpop.f32.mrf.mxu1 }
 0x274   :  { %v320_v26 = vrot.slane %v296_v25, 6  ;;  %v342_v38 = vadd.f32 %v947_v2, %v316_v33 }
 0x276   :  { %v322_v27 = vadd.f32 %v320_v26, %v944_v59  ;;  %v344_v42 = vrot.slane %v342_v38, 6 }
 0x278   :  { %v654_v28 = vmul.f32 -1.442695, %v322_v27 }
 0x27a   :  { %681 = vpow2.f32 %v654_v28 }
 0x280   :  { %v682_v29 = vpop.eup %681 }
 0x281   :  { %v326_v30 = vadd.f32 1.0, %v682_v29 }
 0x283   :  { %683 = vrcp.f32 %v326_v30  ;;  %v338_v35 = vand.u32 2147483648, %v326_v30  ;;  %v336_v37 = vand.u32 2147483647, %v326_v30  ;;  %vm332_vm12 = vweird.f32 %v326_v30 }
 0x285   :  { %v339_v40 = vor.u32 1.1754944e-38, %v338_v35  ;;  %vm337_vm14 = vcmp.eq.f32.partialorder %v336_v37, 8.507059e+37 }
 0x289   :  { %v684_v31 = vpop.eup %683 }
 0x28a   :  { %v328_v32 = vmul.f32 %v684_v31, %v326_v30  ;;  %vm333_vm11 = vweird.f32 %v684_v31 }
 0x28b   :  { %vm334_vm13 = vmor %vm332_vm12, %vm333_vm11  ;;  %vm616_vm11 = vcmask 1040384   ;;  %vm619_vm12 = vcmask 1042432  }
 0x28c   :  { %v329_v34 = vsub.f32 1.0, %v328_v32 }
 0x28e   :  { %v330_v36 = vmul.f32 %v684_v31, %v329_v34 }
 0x290   :  { %v331_v39 = vadd.f32 %v684_v31, %v330_v36 }
 0x292   :  { %v335_v41 = vsel %vm334_vm13, %v684_v31, %v331_v39  ;;  %vm622_vm13 = vcmask 1044480  }
 0x293   :  { %v340_v43 = vsel %vm337_vm14, %v339_v40, %v335_v41  ;;  %vm629_vm14 = vcmask 97280  }
 0x294   :  { %v346_v44 = vmul.f32 %v344_v42, %v340_v43  ;;  %v349_v47 = vsub.f32 1.0, %v340_v43  ;;  %v357_v51 = vmul.f32 %v355_v48, %v340_v43 }
 0x296   :  { %v347_v45 = vadd.f32 %v346_v44, %v950_v15 }
 0x298   :  { %685 = vtanh.f32 %v347_v45 }
 0x29e   :  { %v686_v46 = vpop.eup %685 }
 0x29f   :  { %351 = vrot.lane.b32.xlu0 %v686_v46, %s809_s0 }
 0x311   :  { %v352_v49 = vpop.permute.xlu0 %351 }
 0x312   :  { %v354_v50 = vmul.f32 %v352_v49, %v349_v47  ;;  %v548_v49 = vld [vmem:[#allocation5 + $0x130] sm:$0xff] }
 0x313   :  { %563 = vmatpush.msra.mxu2 %v548_v49 }
 0x314   :  { %v358_v52 = vadd.f32 %v357_v51, %v354_v50  ;;  %v549_v50 = vld [vmem:[#allocation5 + $0x138] sm:$0xff]  ;;  %v547_v51 = vld [vmem:[#allocation5 + $0x128] sm:$0xff] }
 0x315   :  { %583 = vmatpush.msra.mxu3 %v549_v50 }
 0x316   :  { %v360_v53 = vrot.slane %v358_v52, 2  ;;  %v441_v11 = vrot.slane %v358_v52, 6  ;;  %v531_v22 = vsel %vm115_vm2, %v954_v23, %v358_v52  ;;  %v544_v52 = vld [vmem:[#allocation5 + $0x110] sm:$0xff] }
 0x317   :  { %584 = vmatpush.msra.mxu3 %v547_v51 }
 0x318   :  { %361 = vrot.lane.b32.xlu1 %v360_v53, %s809_s0  ;;  %v545_v53 = vld [vmem:[#allocation5 + $0x118] sm:$0xff] }
 0x319   :  { %585 = vmatpush.msra.mxu3 %v545_v53 }
 0x38a   :  { %v362_v54 = vpop.permute.xlu1 %361 }
 0x38b   :  { %655 = vmatmul.msk.f32.vlgmr.msrb.gmra.mxu2 %vm198_vm10, %v362_v54  ;;  %656 = vmatmul.msk.f32.vlgmr.msrb.gmra.mxu3 %vm198_vm10, %v362_v54  ;;  %v542_v54 = vld [vmem:[#allocation5 + $0x100] sm:$0xff] }
 0x40e   :  { %v382_v55 = vpop.f32.mrf.mxu2  ;;  %v402_v0 = vpop.f32.mrf.mxu3 }
 0x40f   :  { %v406_v56 = vrot.slane %v382_v55, 4  ;;  %v428_v6 = vadd.f32 %v947_v2, %v402_v0  ;;  %v543_v55 = vld [vmem:[#allocation5 + $0x108] sm:$0xff] }
 0x410   :  { %586 = vmatpush.msra.mxu3 %v543_v55 }
 0x411   :  { %v408_v57 = vadd.f32 %v406_v56, %v944_v59  ;;  %v430_v10 = vrot.slane %v428_v6, 4  ;;  %v540_v56 = vld [vmem:[#allocation5 + $0xf0] sm:$0xff] }
 0x413   :  { %v657_v58 = vmul.f32 -1.442695, %v408_v57  ;;  %v538_v57 = vld [vmem:[#allocation5 + $0xe0] sm:$0xff] }
 0x415   :  { %687 = vpow2.f32 %v657_v58  ;;  %v539_v58 = vld [vmem:[#allocation5 + $0xe8] sm:$0xff] }
 0x41b   :  { %v688_v60 = vpop.eup %687 }
 0x41c   :  { %v412_v61 = vadd.f32 1.0, %v688_v60  ;;  %v536_v60 = vld [vmem:[#allocation5 + $0xd0] sm:$0xff] }
 0x41e   :  { %689 = vrcp.f32 %v412_v61  ;;  %v424_v3 = vand.u32 2147483648, %v412_v61  ;;  %v422_v5 = vand.u32 2147483647, %v412_v61  ;;  %vm418_vm0 = vweird.f32 %v412_v61 }
 0x420   :  { %v425_v8 = vor.u32 1.1754944e-38, %v424_v3  ;;  %vm423_vm5 = vcmp.eq.f32.partialorder %v422_v5, 8.507059e+37 }
 0x424   :  { %v690_v62 = vpop.eup %689 }
 0x425   :  { %v414_v63 = vmul.f32 %v690_v62, %v412_v61  ;;  %vm419_vm15 = vweird.f32 %v690_v62  ;;  %v537_v61 = vld [vmem:[#allocation5 + $0xd8] sm:$0xff] }
 0x426   :  { %vm420_vm1 = vmor %vm418_vm0, %vm419_vm15 }
 0x427   :  { %v415_v1 = vsub.f32 1.0, %v414_v63  ;;  %v535_v63 = vld [vmem:[#allocation5 + $0xc8] sm:$0xff] }
 0x429   :  { %v416_v4 = vmul.f32 %v690_v62, %v415_v1 }
 0x42b   :  { %v417_v7 = vadd.f32 %v690_v62, %v416_v4 }
 0x42d   :  { %v421_v9 = vsel %vm420_vm1, %v690_v62, %v417_v7  ;;  %v534_v62 = vld [vmem:[#allocation5 + $0xc0] sm:$0xff] }
 0x42e   :  { %v426_v12 = vsel %vm423_vm5, %v425_v8, %v421_v9 }
 0x42f   :  { %v432_v13 = vmul.f32 %v430_v10, %v426_v12  ;;  %v443_v14 = vmul.f32 %v441_v11, %v426_v12  ;;  %v435_v18 = vsub.f32 1.0, %v426_v12 }
 0x431   :  { %v433_v16 = vadd.f32 %v432_v13, %v950_v15 }
 0x433   :  { %691 = vtanh.f32 %v433_v16 }
 0x439   :  { %v692_v17 = vpop.eup %691 }
 0x43a   :  { %437 = vrot.lane.b32.xlu2 %v692_v17, %s809_s0 }
 0x494   :  { %v438_v19 = vpop.permute.xlu2 %437 }
 0x495   :  { %v440_v20 = vmul.f32 %v438_v19, %v435_v18 }
 0x497   :  { %v444_v21 = vadd.f32 %v443_v14, %v440_v20 }
 0x499   :  { %v446_v24 = vrot.slane %v444_v21, 4  ;;  %v975_v25 = vsel %vm117_vm3, %v531_v22, %v444_v21  ;;  %v527_v43 = vrot.slane %v444_v21, 6 }
 0x49b   :  { %447 = vrot.lane.b32.xlu0 %v446_v24, %s809_s0 }
 0x50d   :  { %v448_v26 = vpop.permute.xlu0 %447 }
 0x50e   :  { %658 = vmatmul.msk.f32.vlgmr.msra.gmra.mxu0 %vm198_vm10, %v448_v26  ;;  %659 = vmatmul.msk.f32.vlgmr.msra.gmra.mxu1 %vm198_vm10, %v448_v26 }
 0x58b   :  { %v468_v27 = vpop.f32.mrf.mxu0  ;;  %v488_v34 = vpop.f32.mrf.mxu1 }
 0x58c   :  { %v492_v28 = vrot.slane %v468_v27, 2  ;;  %v514_v39 = vadd.f32 %v947_v2, %v488_v34  ;;  %v546_v2 = vld [vmem:[#allocation5 + $0x120] sm:$0xff] }
 0x58d   :  { %564 = vmatpush.msra.mxu2 %v546_v2 }
 0x58e   :  { %v494_v29 = vadd.f32 %v492_v28, %v944_v59  ;;  %v516_v42 = vrot.slane %v514_v39, 2 }
 0x58f   :  { %565 = vmatpush.msra.mxu2 %v544_v52 }
 0x590   :  { %v660_v30 = vmul.f32 -1.442695, %v494_v29 }
 0x591   :  { %566 = vmatpush.msra.mxu2 %v542_v54 }
 0x592   :  { %693 = vpow2.f32 %v660_v30 }
 0x593   :  { %567 = vmatpush.msra.mxu2 %v540_v56 }
 0x595   :  { %568 = vmatpush.msra.mxu2 %v538_v57 }
 0x597   :  { %569 = vmatpush.msra.mxu2 %v536_v60 }
 0x598   :  { %v694_v31 = vpop.eup %693 }
 0x599   :  { %v498_v32 = vadd.f32 1.0, %v694_v31  ;;  %570 = vmatpush.msra.mxu2 %v534_v62 }
 0x59b   :  { %695 = vrcp.f32 %v498_v32  ;;  %v510_v36 = vand.u32 2147483648, %v498_v32  ;;  %v508_v38 = vand.u32 2147483647, %v498_v32  ;;  %vm504_vm7 = vweird.f32 %v498_v32 }
 0x59d   :  { %v511_v41 = vor.u32 1.1754944e-38, %v510_v36  ;;  %vm509_vm9 = vcmp.eq.f32.partialorder %v508_v38, 8.507059e+37 }
 0x5a1   :  { %v696_v23 = vpop.eup %695 }
 0x5a2   :  { %v500_v33 = vmul.f32 %v696_v23, %v498_v32  ;;  %vm505_vm6 = vweird.f32 %v696_v23 }
 0x5a3   :  { %vm506_vm8 = vmor %vm504_vm7, %vm505_vm6 }
 0x5a4   :  { %v501_v35 = vsub.f32 1.0, %v500_v33 }
 0x5a6   :  { %v502_v37 = vmul.f32 %v696_v23, %v501_v35 }
 0x5a8   :  { %v503_v40 = vadd.f32 %v696_v23, %v502_v37 }
 0x5aa   :  { %v507_v59 = vsel %vm506_vm8, %v696_v23, %v503_v40 }
 0x5ab   :  { %v512_v44 = vsel %vm509_vm9, %v511_v41, %v507_v59 }
 0x5ac   :  { %v518_v45 = vmul.f32 %v516_v42, %v512_v44  ;;  %v529_v46 = vmul.f32 %v527_v43, %v512_v44  ;;  %v521_v0 = vsub.f32 1.0, %v512_v44 }
 0x5ae   :  { %v519_v47 = vadd.f32 %v518_v45, %v950_v15  ;;  %v541_v15 = vld [vmem:[#allocation5 + $0xf8] sm:$0xff] }
 0x5af   :  { %587 = vmatpush.msra.mxu3 %v541_v15 }
 0x5b0   :  { %697 = vtanh.f32 %v519_v47 }
 0x5b1   :  { %588 = vmatpush.msra.mxu3 %v539_v58 }
 0x5b3   :  { %589 = vmatpush.msra.mxu3 %v537_v61 }
 0x5b5   :  { %590 = vmatpush.msra.mxu3 %v535_v63 }
 0x5b6   :  { %v698_v48 = vpop.eup %697 }
 0x5b7   :  { %523 = vrot.lane.b32.xlu1 %v698_v48, %s809_s0 }
 0x629   :  { %v524_v1 = vpop.permute.xlu1 %523 }
 0x62a   :  { %v526_v3 = vmul.f32 %v524_v1, %v521_v0 }
 0x62c   :  { %v530_v4 = vadd.f32 %v529_v46, %v526_v3 }
 0x62e   :  { %v533_v5 = vsel %vm119_vm4, %v975_v25, %v530_v4  ;;  %v674_v25 = vld [vmem:[#allocation7 + $0x2] ss:$0 sm:$0xff] }
 0x62f   :  { %551 = vrot.lane.b32.xlu2 %v533_v5, %s809_s0 }
 0x689   :  { %v552_v6 = vpop.permute.xlu2 %551 }
 0x68a   :  { %661 = vmatmul.msk.f32.vlgmr.msra.gmra.mxu2 %vm198_vm10, %v552_v6  ;;  %662 = vmatmul.msk.f32.vlgmr.msra.gmra.mxu3 %vm198_vm10, %v552_v6  ;;  %vm625_vm10 = vcmask 1046528  }
 0x70d   :  { %v592_v7 = vpop.f32.mrf.mxu3  ;;  %v572_v10 = vpop.f32.mrf.mxu2 }
 0x70e   :  { %v596_v8 = vrot.slane %v592_v7, 6  ;;  %v599_v9 = vrot.slane %v592_v7, 2 }
 0x710   :  { %v598_v11 = vadd.f32 %v596_v8, %v572_v10  ;;  %v601_v12 = vadd.f32 %v599_v9, %v572_v10 }
 0x712   :  { %v603_v13 = vrot.slane %v601_v12, 1  ;;  %v606_v14 = vrot.slane %v598_v11, 2  ;;  %v608_v16 = vrot.slane %v601_v12, 3  ;;  %v610_v18 = vrot.slane %v598_v11, 5 }
 0x713   :  { %v612_v20 = vrot.slane %v601_v12, 6  ;;  %v614_v22 = vrot.slane %v598_v11, 7 }
 0x714   :  { %v617_v17 = vsel %vm616_vm11, %v598_v11, %v603_v13 }
 0x715   :  { %v618_v19 = vsel %vm115_vm2, %v617_v17, %v606_v14 }
 0x716   :  { %v620_v21 = vsel %vm619_vm12, %v618_v19, %v608_v16 }
 0x717   :  { %v621_v24 = vsel %vm117_vm3, %v620_v21, %v610_v18 }
 0x718   :  { %v623_v26 = vsel %vm622_vm13, %v621_v24, %v612_v20 }
 0x719   :  { %v624_v27 = vsel %vm119_vm4, %v623_v26, %v614_v22 }
 0x71a   :  { %v626_v28 = vsel %vm625_vm10, %v624_v27, %v601_v12 }
 0x71b   :  { %v628_v29 = vadd.f32 %v674_v25, %v626_v28 }
 0x71d   :  { %630 = vst.msk [vmem:[#allocation8] sm:$0xff] %vm629_vm14, %v628_v29 }
 0x71e   :  { %641 = dma.vmem_to_hbm [thread:$0]  %s637_s30, 128, %s639_s6, [#allocation4]  }
 0x71f   :  { %799 = dma.done.wait [#allocation4], 128  }
 0x720   :  { %800 = vsyncadd [#allocation4], 4294967168 }
 0x721   :  { %646 = vsyncpa [#allocation3], 1 }
 0x722   :  { %647 = vsyncpa [#allocation6], 1 }
 0x723   :  { %648 = vsyncpa [#allocation4], 1 }

</bundles_post_ra>
